<compile_context>
chip_gen: v7x
topology: tpu7x:2x2x1
jax: 0.10.0
libtpu: 0.0.40
codegen_flags: <defaults>
</compile_context>

<pallas_src>
import functools

import jax
import jax.numpy as jnp
from jax.experimental import pallas as pl
from jax.experimental.pallas import tpu as pltpu

LANE = 128            # lane width (last-dim tile)
SUBLANE = 8           # sublane width (second-to-last-dim tile)
MAX_ROW_TILE = 2048   # batch rows per grid step (amortizes ~0.35us/step overhead,
                      # stays well inside v5e's 16 MiB scoped-VMEM default)
TC_SPLIT_MIN_ROWS = 256  # once the padded batch is this big, force grid >= 2
                         # so v7x's second TensorCore gets work


def _round_up(x, m):
    return (x + m - 1) // m * m


def mlp_packed_kernel(x_ref, w_ref, b_ref, o_ref, *, in_size, hid_p, out_p):
    """Fused 3-layer MLP on one (TM, in_size) activation tile.

    x_ref: (TM, in_size)          activation tile (unpadded feature dim)
    w_ref: (R, 2*hid_p + out_p)   packed [w1 | w2 | w3], 128-aligned columns
    b_ref: (1, 2*hid_p + out_p)   packed [b1 | b2 | b3]
    o_ref: (TM, out_p)            lane-dense output tile
    """
    x = x_ref[...]

    # Static slices of the packed parameter slab (column offsets 128-aligned).
    w1 = w_ref[0:in_size, 0:hid_p]
    w2 = w_ref[0:hid_p, hid_p:2 * hid_p]
    w3 = w_ref[0:hid_p, 2 * hid_p:2 * hid_p + out_p]
    b1 = b_ref[:, 0:hid_p]
    b2 = b_ref[:, hid_p:2 * hid_p]
    b3 = b_ref[:, 2 * hid_p:2 * hid_p + out_p]

    h1 = jnp.maximum(jnp.dot(x, w1, preferred_element_type=jnp.float32) + b1, 0.0)
    h2 = jnp.maximum(jnp.dot(h1, w2, preferred_element_type=jnp.float32) + b2, 0.0)
    out = jnp.dot(h2, w3, preferred_element_type=jnp.float32) + b3
    o_ref[...] = out.astype(o_ref.dtype)


def pack_params(params):
    """One-time packing: pad hidden/output feature dims to 128 lanes and fuse
    the six parameter tensors into one weight slab + one bias row.
    (The input feature dim stays unpadded; only the slab rows cover it.)"""
    w1, b1, w2, b2, w3, b3 = params
    in_size, hid = w1.shape
    out_size = w3.shape[1]

    hid_p = _round_up(hid, LANE)
    out_p = _round_up(out_size, LANE)
    rows = max(_round_up(in_size, SUBLANE), hid_p)
    cols = 2 * hid_p + out_p

    w_packed = jnp.zeros((rows, cols), jnp.float32)
    w_packed = w_packed.at[:in_size, 0:hid].set(w1)
    w_packed = w_packed.at[:hid, hid_p:hid_p + hid].set(w2)
    w_packed = w_packed.at[:hid, 2 * hid_p:2 * hid_p + out_size].set(w3)

    b_packed = jnp.zeros((1, cols), jnp.float32)
    b_packed = b_packed.at[:, 0:hid].set(b1)
    b_packed = b_packed.at[:, hid_p:hid_p + hid].set(b2)
    b_packed = b_packed.at[:, 2 * hid_p:2 * hid_p + out_size].set(b3)

    meta = (in_size, hid, out_size, hid_p, out_p)
    return w_packed, b_packed, meta


@functools.partial(jax.jit, static_argnums=(3,))
def _forward_jit(x, w_packed, b_packed, meta):
    in_size, _, out_size, hid_p, out_p = meta
    B = x.shape[0]

    # Pad batch only to a sublane multiple (waste bounded by 7 rows).
    b_pad = _round_up(B, SUBLANE)
    tm = min(MAX_ROW_TILE, b_pad)
    # v7x: ensure the "parallel" batch axis has >= 2 grid steps when there is
    # enough work, so both TensorCores engage (harmless on v5e/v6e).
    if b_pad >= TC_SPLIT_MIN_ROWS:
        tm = min(tm, _round_up(pl.cdiv(b_pad, 2), SUBLANE))
    grid = (pl.cdiv(b_pad, tm),)  # partial last block handled (masked) by Pallas

    x_pad = x if b_pad == B else jnp.pad(x, ((0, b_pad - B), (0, 0)))

    kernel = functools.partial(
        mlp_packed_kernel, in_size=in_size, hid_p=hid_p, out_p=out_p)

    y_pad = pl.pallas_call(
        kernel,
        out_shape=jax.ShapeDtypeStruct((b_pad, out_p), jnp.float32),
        grid=grid,
        in_specs=[
            # Activations stream across the batch grid; feature dim unpadded
            # (block last dim == full array extent).
            pl.BlockSpec((tm, in_size), lambda i: (i, 0)),
            # Weights/biases: constant block index -> stay VMEM-resident.
            pl.BlockSpec(w_packed.shape, lambda i: (0, 0)),
            pl.BlockSpec(b_packed.shape, lambda i: (0, 0)),
        ],
        out_specs=pl.BlockSpec((tm, out_p), lambda i: (i, 0)),
        compiler_params=pltpu.CompilerParams(
            dimension_semantics=("parallel",)),  # shard batch over v7x's 2 TCs
    )(x_pad, w_packed, b_packed)

    # Crop fuses under jit (no standalone extra HBM pass).
    return y_pad[:B, :out_size]


def neural_net_forward(x, packed):
    """x: (B, input_size) f32 -> (B, output_size) f32."""
    w_packed, b_packed, meta = packed
    return _forward_jit(x, w_packed, b_packed, meta)


def init_params(key, input_size, hidden_size, output_size):
    # PyTorch-style uniform(-1/sqrt(fan_in), 1/sqrt(fan_in)) init.
    # Weights stored pre-transposed as [in, out]; biases as [1, out].
    ks = jax.random.split(key, 6)

    def lin(kw, kb, fan_in, fan_out):
        bound = 1.0 / jnp.sqrt(jnp.float32(fan_in))
        w = jax.random.uniform(kw, (fan_in, fan_out), jnp.float32, -bound, bound)
        b = jax.random.uniform(kb, (1, fan_out), jnp.float32, -bound, bound)
        return w, b

    w1, b1 = lin(ks[0], ks[1], input_size, hidden_size)
    w2, b2 = lin(ks[2], ks[3], hidden_size, hidden_size)
    w3, b3 = lin(ks[4], ks[5], hidden_size, output_size)
    return (w1, b1, w2, b2, w3, b3)


def reference_forward(x, params):
    w1, b1, w2, b2, w3, b3 = params
    h1 = jnp.maximum(x @ w1 + b1, 0.0)
    h2 = jnp.maximum(h1 @ w2 + b2, 0.0)
    return h2 @ w3 + b3


if __name__ == "__main__":
    # Small shapes consistent with the module: bag-of-words input, hidden=8.
    input_size = 32   # len(X_train[0])
    hidden_size = 8
    output_size = 6   # len(tags)

    key = jax.random.PRNGKey(0)
    k_x, k_x2, k_x3, k_p = jax.random.split(key, 4)
    params = init_params(k_p, input_size, hidden_size, output_size)
    packed = pack_params(params)

    def check(k, batch):
        x = jax.random.uniform(k, (batch, input_size), jnp.float32)
        out = jax.block_until_ready(neural_net_forward(x, packed))
        ref = reference_forward(x, params)
        assert out.shape == (batch, output_size)
        assert jnp.allclose(out, ref, atol=1e-5, rtol=1e-5)

    check(k_x, 4)      # tiny batch (grid=1)
    check(k_x2, 20)    # sublane-padded batch (grid=1)
    check(k_x3, 1000)  # multi-step grid (>=2 blocks) + masked partial last block

    print("KERNEL_OK")
</pallas_src>

<mosaic_0001>
module attributes {stable_mosaic.version = 11 : i64} {
  func.func @mlp_packed_kernel(%arg0: i32, %arg1: memref<8x32xf32, #tpu.memory_space<vmem>>, %arg2: memref<128x384xf32, #tpu.memory_space<vmem>>, %arg3: memref<1x384xf32, #tpu.memory_space<vmem>>, %arg4: memref<8x128xf32, #tpu.memory_space<vmem>>) attributes {dimension_semantics = [#tpu.dimension_semantics<parallel>], iteration_bounds = array<i64: 1>, scalar_prefetch = 0 : i64, scratch_operands = 0 : i64, tpu.core_type = #tpu.core_type<tc>, window_params = [{transform_indices = @transform_0, window_bounds = array<i64: 8, 32>}, {pipeline_mode = #tpu.pipeline_mode<synchronous>, transform_indices = @transform_1, window_bounds = array<i64: 128, 384>}, {pipeline_mode = #tpu.pipeline_mode<synchronous>, transform_indices = @transform_2, window_bounds = array<i64: 1, 384>}, {transform_indices = @transform_3, window_bounds = array<i64: 8, 128>}]} {
    %c0 = arith.constant 0 : index
    %c0_0 = arith.constant 0 : index
    %0 = vector.load %arg1[%c0, %c0_0] : memref<8x32xf32, #tpu.memory_space<vmem>>, vector<8x32xf32>
    %c0_1 = arith.constant 0 : index
    %c0_2 = arith.constant 0 : index
    %1 = vector.load %arg2[%c0_1, %c0_2] : memref<128x384xf32, #tpu.memory_space<vmem>>, vector<32x128xf32>
    %c0_3 = arith.constant 0 : index
    %c128 = arith.constant 128 : index
    %2 = vector.load %arg2[%c0_3, %c128] : memref<128x384xf32, #tpu.memory_space<vmem>>, vector<128x128xf32>
    %c0_4 = arith.constant 0 : index
    %c256 = arith.constant 256 : index
    %3 = vector.load %arg2[%c0_4, %c256] : memref<128x384xf32, #tpu.memory_space<vmem>>, vector<128x128xf32>
    %c0_5 = arith.constant 0 : index
    %c0_6 = arith.constant 0 : index
    %4 = vector.load %arg3[%c0_5, %c0_6] : memref<1x384xf32, #tpu.memory_space<vmem>>, vector<1x128xf32>
    %c0_7 = arith.constant 0 : index
    %c128_8 = arith.constant 128 : index
    %5 = vector.load %arg3[%c0_7, %c128_8] : memref<1x384xf32, #tpu.memory_space<vmem>>, vector<1x128xf32>
    %c0_9 = arith.constant 0 : index
    %c256_10 = arith.constant 256 : index
    %6 = vector.load %arg3[%c0_9, %c256_10] : memref<1x384xf32, #tpu.memory_space<vmem>>, vector<1x128xf32>
    %cst = arith.constant dense<0.000000e+00> : vector<8x128xf32>
    %7 = tpu.matmul %0, %1, %cst {dimension_numbers = #tpu.dot_dimension_numbers<[1], [0], [0], [1], [0, 0, 1, 1], [], []>} : vector<8x32xf32>, vector<32x128xf32>, vector<8x128xf32> -> vector<8x128xf32>
    %8 = vector.broadcast %4 : vector<1x128xf32> to vector<8x128xf32>
    %9 = arith.addf %7, %8 : vector<8x128xf32>
    %cst_11 = arith.constant 0.000000e+00 : f32
    %10 = vector.broadcast %cst_11 : f32 to vector<8x128xf32>
    %11 = arith.maximumf %9, %10 : vector<8x128xf32>
    %cst_12 = arith.constant dense<0.000000e+00> : vector<8x128xf32>
    %12 = tpu.matmul %11, %2, %cst_12 {dimension_numbers = #tpu.dot_dimension_numbers<[1], [0], [0], [1], [0, 0, 1, 1], [], []>} : vector<8x128xf32>, vector<128x128xf32>, vector<8x128xf32> -> vector<8x128xf32>
    %13 = vector.broadcast %5 : vector<1x128xf32> to vector<8x128xf32>
    %14 = arith.addf %12, %13 : vector<8x128xf32>
    %cst_13 = arith.constant 0.000000e+00 : f32
    %15 = vector.broadcast %cst_13 : f32 to vector<8x128xf32>
    %16 = arith.maximumf %14, %15 : vector<8x128xf32>
    %cst_14 = arith.constant dense<0.000000e+00> : vector<8x128xf32>
    %17 = tpu.matmul %16, %3, %cst_14 {dimension_numbers = #tpu.dot_dimension_numbers<[1], [0], [0], [1], [0, 0, 1, 1], [], []>} : vector<8x128xf32>, vector<128x128xf32>, vector<8x128xf32> -> vector<8x128xf32>
    %18 = vector.broadcast %6 : vector<1x128xf32> to vector<8x128xf32>
    %19 = arith.addf %17, %18 : vector<8x128xf32>
    %c0_15 = arith.constant 0 : index
    %c0_16 = arith.constant 0 : index
    %20 = vector.load %arg4[%c0_15, %c0_16] : memref<8x128xf32, #tpu.memory_space<vmem>>, vector<8x128xf32>
    tpu.vector_store %arg4[%c0_15, %c0_16], %19 {strides = array<i32>} : memref<8x128xf32, #tpu.memory_space<vmem>>, vector<8x128xf32>,
    return
  }
  func.func @transform_0(%arg0: i32) -> (i32, i32) {
    %c0_i32 = arith.constant 0 : i32
    %c0_i32_0 = arith.constant 0 : i32
    return %arg0, %c0_i32 : i32, i32
  }
  func.func @transform_1(%arg0: i32) -> (i32, i32) {
    %c0_i32 = arith.constant 0 : i32
    %c0_i32_0 = arith.constant 0 : i32
    %c0_i32_1 = arith.constant 0 : i32
    return %c0_i32, %c0_i32_0 : i32, i32
  }
  func.func @transform_2(%arg0: i32) -> (i32, i32) {
    %c0_i32 = arith.constant 0 : i32
    %c0_i32_0 = arith.constant 0 : i32
    %c0_i32_1 = arith.constant 0 : i32
    return %c0_i32, %c0_i32_0 : i32, i32
  }
  func.func @transform_3(%arg0: i32) -> (i32, i32) {
    %c0_i32 = arith.constant 0 : i32
    %c0_i32_0 = arith.constant 0 : i32
    return %arg0, %c0_i32 : i32, i32
  }
}

</mosaic_0001>

<bundles_post_ra>
// kernel: _forward_jit.1
= control target key start
LH: loop header
LB: loop body
LE: loop exit
PB: predicated region body
PF: predicated region fallthrough
CT: control target
= control target key end

     0   :  { %8 = vsyncpa [#allocation3], 0  ;;  %s516_s12 = smov [#allocation2]   ;;  %s590_s0 = inlined_call_operand.vmem [shape: f32[8,32], index: 0, kind: input, shape index: {}]   ;;  %s591_s1 = inlined_call_operand.hbm [shape: f32[128,384], index: 1, kind: input, shape index: {}]   ;;  %s592_s2 = inlined_call_operand.vmem [shape: f32[1,384], index: 2, kind: input, shape index: {}]   ;;  %s593_s3 = inlined_call_operand.vmem [shape: f32[8,128], index: 3, kind: output, shape index: {}]  }
   0x1   :  { %s16_s13 = sshll.u32 %s516_s12, 4  ;;  %s492_s16 = scalar_lea.hbm %s591_s1, 6144  ;;  %s17_s13 = int_to_ptr.vmem [resolvable:$true] %s16_s13 }
   0x2   :  { %p493_p0 = scmp.ne.s32.totalorder %s591_s1, %s492_s16  ;;  %p496_p1 = scmp.lt.u32.totalorder %s492_s16, %s591_s1 }
   0x4   :  { %p498_p2 = pnand %p496_p1, %p493_p0 }
   0x6   :  { %501 = shalt.err (!%p498_p2)
}
   0x7   :  { %s502_s21 = scalar_lea.vmem %s17_s13, 6144  ;;  %p507_p4 = scmp.lt.s32.totalorder %s17_s13, %s17_s13 }
   0x8   :  { %p503_p3 = scmp.ne.s32.totalorder %s17_s13, %s502_s21  ;;  %p508_p5 = scmp.lt.s32.totalorder %s502_s21, %s502_s21 }
   0xa   :  { %p509_p6 = por %p508_p5, %p507_p4 }
   0xc   :  { %p510_p7 = pnand %p509_p6, %p503_p3 }
   0xe   :  { %513 = shalt.err (!%p510_p7)
}
   0xf   :  { %s517_s22 = smov 384   ;;  %s518_s23 = smov 24  }
  0x10   :  { %22 = dma.hbm_to_vmem [thread:$0]  %s591_s1, 6144, %s17_s13, [#allocation3], %s517_s22, %s517_s22, %s518_s23  }
  0x11   :  { %514 = dma.done.wait [#allocation3], 6144  }
  0x12   :  { %515 = vsyncadd [#allocation3], 4294961152  ;;  %v519_v0 = vmov 0.0|0.0   ;;  %vm520_vm0 = vmmov 0   ;;  %v521_v1 = vmov 0.0   ;;  %v29_v2 = vld [vmem:[#allocation2] sm:$0xff] }
  0x13   :  { %432 = vmatprep.subr.bf16.mxu0 %v519_v0  ;;  %359 = vmatprep.mubr.msk.f32.mxu0 %vm520_vm0, %v521_v1  ;;  %v30_v3 = vld [vmem:[#allocation2 + $0x18] sm:$0xff]  ;;  %v31_v4 = vld [vmem:[#allocation2 + $0x30] sm:$0xff]  ;;  %v32_v6 = vld [vmem:[#allocation2 + $0x48] sm:$0xff]  ;;  %vm74_vm1 = vcmask 261120  }
  0x14   :  { %438 = vmatprep.subr.bf16.mxu1 %v519_v0  ;;  %394 = vmatprep.mubr.msk.f32.mxu1 %vm520_vm0, %v521_v1  ;;  %v433_v5 = vpack.c.bf16 %v30_v3, %v29_v2  ;;  %v33_v7 = vld [vmem:[#allocation2 + $0x8] sm:$0xff]  ;;  %v34_v8 = vld [vmem:[#allocation2 + $0x20] sm:$0xff]  ;;  %v35_v9 = vld [vmem:[#allocation2 + $0x38] sm:$0xff]  ;;  %v436_v11 = vpack.c.bf16 %v32_v6, %v31_v4 }
  0x15   :  { %v36_v10 = vld [vmem:[#allocation2 + $0x50] sm:$0xff]  ;;  %v439_v12 = vpack.c.bf16 %v34_v8, %v33_v7  ;;  %v37_v14 = vld [vmem:[#allocation2 + $0x68] sm:$0xff]  ;;  %v38_v15 = vld [vmem:[#allocation2 + $0x80] sm:$0xff] }
  0x16   :  { %434 = vmatpush3.bf16.msra.mxu0 %v433_v5  ;;  %v442_v13 = vpack.c.bf16 %v36_v10, %v35_v9  ;;  %v28_v16 = vld [vmem:[%s590_s0] sm:$0xff]  ;;  %v445_v17 = vpack.c.bf16 %v38_v15, %v37_v14  ;;  %v39_v18 = vld [vmem:[#allocation2 + $0x98] sm:$0xff]  ;;  %v40_v19 = vld [vmem:[#allocation2 + $0xb0] sm:$0xff] }
  0x17   :  { %435 = vmatprep.subr.bf16.mxu0 %v519_v0  ;;  %440 = vmatpush3.bf16.msra.mxu1 %v439_v12  ;;  %v448_v20 = vpack.c.bf16 %v40_v19, %v39_v18  ;;  %v41_v21 = vld [vmem:[#allocation2 + $0xc8] sm:$0xff]  ;;  %v42_v22 = vld [vmem:[#allocation2 + $0xe0] sm:$0xff]  ;;  %v43_v24 = vld [vmem:[#allocation2 + $0xf8] sm:$0xff] }
  0x18   :  { %441 = vmatprep.subr.bf16.mxu1 %v519_v0  ;;  %v451_v23 = vpack.c.bf16 %v42_v22, %v41_v21  ;;  %v44_v25 = vld [vmem:[#allocation2 + $0x110] sm:$0xff]  ;;  %v45_v27 = vld [vmem:[#allocation2 + $0x128] sm:$0xff]  ;;  %v46_v28 = vld [vmem:[#allocation2 + $0x140] sm:$0xff] }
  0x19   :  { %v454_v26 = vpack.c.bf16 %v44_v25, %v43_v24  ;;  %v457_v29 = vpack.c.bf16 %v46_v28, %v45_v27  ;;  %v47_v30 = vld [vmem:[#allocation2 + $0x158] sm:$0xff]  ;;  %v48_v31 = vld [vmem:[#allocation2 + $0x170] sm:$0xff]  ;;  %v50_v34 = vld [vmem:[#allocation2 + $0x28] sm:$0xff] }
  0x1a   :  { %437 = vmatpush3.bf16.msra.mxu0 %v436_v11  ;;  %v460_v32 = vpack.c.bf16 %v48_v31, %v47_v30  ;;  %v49_v33 = vld [vmem:[#allocation2 + $0x10] sm:$0xff]  ;;  %v51_v35 = vld [vmem:[#allocation2 + $0x40] sm:$0xff]  ;;  %v52_v37 = vld [vmem:[#allocation2 + $0x58] sm:$0xff] }
  0x1b   :  { %462 = vmatprep.subr.bf16.mxu0 %v519_v0  ;;  %443 = vmatpush3.bf16.msra.mxu1 %v442_v13  ;;  %v463_v36 = vpack.c.bf16 %v50_v34, %v49_v33  ;;  %v466_v38 = vpack.c.bf16 %v52_v37, %v51_v35  ;;  %v53_v39 = vld [vmem:[#allocation2 + $0x70] sm:$0xff]  ;;  %v54_v40 = vld [vmem:[#allocation2 + $0x88] sm:$0xff]  ;;  %v55_v42 = vld [vmem:[#allocation2 + $0xa0] sm:$0xff] }
  0x1c   :  { %444 = vmatprep.subr.bf16.mxu1 %v519_v0  ;;  %v469_v41 = vpack.c.bf16 %v54_v40, %v53_v39  ;;  %v56_v43 = vld [vmem:[#allocation2 + $0xb8] sm:$0xff]  ;;  %v57_v45 = vld [vmem:[#allocation2 + $0xd0] sm:$0xff]  ;;  %v58_v46 = vld [vmem:[#allocation2 + $0xe8] sm:$0xff] }
  0x1d   :  { %360 = vmatmul.mubr.msk.f32.vlgmr.msra.gmra.mrb[0].mxu0 %vm74_vm1, %v28_v16  ;;  %v472_v44 = vpack.c.bf16 %v56_v43, %v55_v42  ;;  %v475_v47 = vpack.c.bf16 %v58_v46, %v57_v45  ;;  %v59_v48 = vld [vmem:[#allocation2 + $0x100] sm:$0xff]  ;;  %v60_v49 = vld [vmem:[#allocation2 + $0x118] sm:$0xff]  ;;  %v61_v51 = vld [vmem:[#allocation2 + $0x130] sm:$0xff] }
  0x1e   :  { %429 = vmatprep.mubr.msk.f32.mxu0 %vm520_vm0, %v521_v1  ;;  %464 = vmatpush3.bf16.msra.mxu0 %v463_v36  ;;  %v478_v50 = vpack.c.bf16 %v60_v49, %v59_v48  ;;  %v62_v52 = vld [vmem:[#allocation2 + $0x148] sm:$0xff]  ;;  %v308_v54 = vld [vmem:[%s592_s2] ss:$0 sm:$0xff]  ;;  %v64_v60 = vld [vmem:[#allocation2 + $0x178] sm:$0xff] }
  0x1f   :  { %446 = vmatpush3.bf16.msra.mxu1 %v445_v17  ;;  %465 = vmatprep.subr.bf16.mxu0 %v519_v0  ;;  %v481_v53 = vpack.c.bf16 %v62_v52, %v61_v51  ;;  %v63_v59 = vld [vmem:[#allocation2 + $0x160] sm:$0xff] }
  0x20   :  { %447 = vmatprep.subr.bf16.mxu1 %v519_v0  ;;  %v484_v61 = vpack.c.bf16 %v64_v60, %v63_v59  ;;  %v310_v62 = vld [vmem:[%s592_s2 + $0x1] ss:$0 sm:$0xff]  ;;  %v311_v3 = vld [vmem:[%s592_s2 + $0x2] ss:$0 sm:$0xff] }
  0x22   :  { %467 = vmatpush3.bf16.msra.mxu0 %v466_v38 }
  0x23   :  { %449 = vmatpush3.bf16.msra.mxu1 %v448_v20  ;;  %468 = vmatprep.subr.bf16.mxu0 %v519_v0 }
  0x24   :  { %450 = vmatprep.subr.bf16.mxu1 %v519_v0 }
  0x26   :  { %470 = vmatpush3.bf16.msra.mxu0 %v469_v41 }
  0x27   :  { %452 = vmatpush3.bf16.msra.mxu1 %v451_v23  ;;  %471 = vmatprep.subr.bf16.mxu0 %v519_v0 }
  0x28   :  { %453 = vmatprep.subr.bf16.mxu1 %v519_v0 }
  0x2a   :  { %473 = vmatpush3.bf16.msra.mxu0 %v472_v44 }
  0x2b   :  { %455 = vmatpush3.bf16.msra.mxu1 %v454_v26  ;;  %474 = vmatprep.subr.bf16.mxu0 %v519_v0 }
  0x2c   :  { %456 = vmatprep.subr.bf16.mxu1 %v519_v0 }
  0x2e   :  { %476 = vmatpush3.bf16.msra.mxu0 %v475_v47 }
  0x2f   :  { %458 = vmatpush3.bf16.msra.mxu1 %v457_v29  ;;  %477 = vmatprep.subr.bf16.mxu0 %v519_v0 }
  0x30   :  { %459 = vmatprep.subr.bf16.mxu1 %v519_v0 }
  0x32   :  { %479 = vmatpush3.bf16.msra.mxu0 %v478_v50 }
  0x33   :  { %461 = vmatpush3.bf16.msra.mxu1 %v460_v32  ;;  %480 = vmatprep.subr.bf16.mxu0 %v519_v0 }
  0x36   :  { %482 = vmatpush3.bf16.msra.mxu0 %v481_v53 }
  0x37   :  { %483 = vmatprep.subr.bf16.mxu0 %v519_v0 }
  0x3a   :  { %485 = vmatpush3.bf16.msra.mxu0 %v484_v61 }
  0xf0   :  { %v144_v55 = vpop.f32.mrb[0].mxu0 }
  0xf1   :  { %v145_v56 = vadd.f32 %v308_v54, %v144_v55  ;;  %v361_v57 = vpop.f32.mrb[1].mxu0 }
  0xf3   :  { %v148_v58 = vmax.f32 %v145_v56, 0.0 }
  0xf5   :  { %395 = vmatmul.mubr.f32.vlgmr.msra.gmra.mrb[0].mxu1 %v148_v58 }
 0x1c8   :  { %v221_v63 = vpop.f32.mrb[0].mxu1 }
 0x1c9   :  { %v222_v1 = vadd.f32 %v310_v62, %v221_v63  ;;  %v396_v0 = vpop.f32.mrb[1].mxu1 }
 0x1cb   :  { %v225_v2 = vmax.f32 %v222_v1, 0.0 }
 0x1cd   :  { %430 = vmatmul.mubr.f32.vlgmr.msra.gmra.mrb[2].mxu0 %v225_v2 }
 0x2a0   :  { %v298_v4 = vpop.f32.mrb[2].mxu0 }
 0x2a1   :  { %v299_v5 = vadd.f32 %v311_v3, %v298_v4  ;;  %v431_v6 = vpop.f32.mrb[3].mxu0 }
 0x2a3   :  { %302 = vst [vmem:[%s593_s3] sm:$0xff] %v299_v5 }
 0x2a4   :  { %307 = vsyncpa [#allocation3], 1 }

</bundles_post_ra>
